<compile_context>
chip_gen: v7x
topology: tpu7x:2x2x1
jax: 0.10.0
libtpu: 0.0.40
codegen_flags: <defaults>
</compile_context>

<pallas_src>
import math
from functools import partial

import jax
import jax.numpy as jnp
from jax.experimental import pallas as pl
from jax.experimental.pallas import tpu as pltpu

BN_EPS = 1e-5  # torch.nn.BatchNorm1d default


# ----------------------------- in-kernel helpers -----------------------------

def _gelu(x):
    # TODO(synk): torch nn.GELU() default is the exact erf formulation; the tanh approximation is
    # used to stay on guaranteed Mosaic-lowerable elementwise ops.
    c = math.sqrt(2.0 / math.pi)
    return 0.5 * x * (1.0 + jnp.tanh(c * (x + 0.044715 * x * x * x)))


def _bn_train_single_pass(x, gamma, beta):
    """Training-mode BatchNorm1d over the node axis, single pass (biased variance)."""
    cnt = x.shape[0]
    s = jnp.sum(x, axis=0, keepdims=True)
    ss = jnp.sum(x * x, axis=0, keepdims=True)
    mean = s / cnt
    var = ss / cnt - mean * mean
    return (x - mean) * jax.lax.rsqrt(var + BN_EPS) * gamma + beta


def _score_row(pw_row, h):
    """tanh(h . w_hat) laid out as a lane-dense (1, N) row via an A @ B^T contraction."""
    s = jax.lax.dot_general(pw_row, h,
                            dimension_numbers=(((1,), (1,)), ((), ())),
                            preferred_element_type=jnp.float32)
    return jnp.tanh(s)


# --------------------------------- kernels -----------------------------------

def layer1_kernel(adj_ref, x_ref, wroot_ref, wrel_ref, brel_ref, gamma_ref, beta_ref, pw_ref,
                  h_out_ref, score_out_ref, *, num_graphs, block_nodes):
    """Fused GraphConv -> GELU -> BatchNorm -> TopK score (layer 1 ordering)."""
    x = x_ref[...]                                           # (N, F)
    wrel = wrel_ref[...]
    # Block-diagonal neighbor aggregation: per-graph (n,n)@(n,F) then @(F,H), written in place.
    for g in range(num_graphs):
        lo = g * block_nodes
        xs = x[lo:lo + block_nodes, :]
        agg = jnp.dot(adj_ref[g], xs, preferred_element_type=jnp.float32)
        h_out_ref[lo:lo + block_nodes, :] = jnp.dot(agg, wrel, preferred_element_type=jnp.float32)
    # Root term is one full (N,F)@(F,H) matmul; add rel-bias in the same pass.
    h = (h_out_ref[...]
         + jnp.dot(x, wroot_ref[...], preferred_element_type=jnp.float32)
         + brel_ref[...])
    h = _gelu(h)
    h = _bn_train_single_pass(h, gamma_ref[...], beta_ref[...])
    h_out_ref[...] = h
    score_out_ref[...] = _score_row(pw_ref[...], h)          # (1, N), lane-dense


def layer2_kernel(adj_ref, x_ref, gamma_ref, beta_ref, wroot_ref, wrel_ref, brel_ref, pw_ref,
                  h_out_ref, score_out_ref, *, num_graphs, block_nodes):
    """Fused BatchNorm -> GELU -> GraphConv -> TopK score (layer 2 ordering)."""
    x = x_ref[...]                                           # (N1, H)
    xact = _gelu(_bn_train_single_pass(x, gamma_ref[...], beta_ref[...]))
    wrel = wrel_ref[...]
    for g in range(num_graphs):
        lo = g * block_nodes
        xs = xact[lo:lo + block_nodes, :]
        agg = jnp.dot(adj_ref[g], xs, preferred_element_type=jnp.float32)
        h_out_ref[lo:lo + block_nodes, :] = jnp.dot(agg, wrel, preferred_element_type=jnp.float32)
    h = (h_out_ref[...]
         + jnp.dot(xact, wroot_ref[...], preferred_element_type=jnp.float32)
         + brel_ref[...])
    h_out_ref[...] = h
    score_out_ref[...] = _score_row(pw_ref[...], h)          # (1, N1)


def readout_linear_kernel(h1_ref, h2_ref, wmax_ref, wmean_ref, b_ref, o_ref):
    """[gmp | gap] readout of both pooled node sets, x1 + x2, then Linear — all fused.

    out = (max1+max2) @ W[:H] + (mean1+mean2) @ W[H:] + b == linear(cat([gmp, gap]) of x1 + x2).
    """
    h1 = h1_ref[...]                                         # (B, k1, H)
    h2 = h2_ref[...]                                         # (B, k2, H)
    mx = jnp.max(h1, axis=1) + jnp.max(h2, axis=1)           # (B, H)
    mn = jnp.mean(h1, axis=1) + jnp.mean(h2, axis=1)         # (B, H)
    o_ref[...] = (jnp.dot(mx, wmax_ref[...], preferred_element_type=jnp.float32)
                  + jnp.dot(mn, wmean_ref[...], preferred_element_type=jnp.float32)
                  + b_ref[...])


# --------------------------- pallas_call wrapper ------------------------------

def _vmem_call(kernel, out_shape, *args):
    """Whole-array (single-block) pallas_call; everything staged through VMEM."""
    vmem = pl.BlockSpec(memory_space=pltpu.MemorySpace.VMEM)
    multi = isinstance(out_shape, (tuple, list))
    return pl.pallas_call(
        kernel,
        out_shape=tuple(out_shape) if multi else out_shape,
        in_specs=[vmem] * len(args),
        out_specs=tuple(vmem for _ in out_shape) if multi else vmem,
    )(*args)


# ------------------------------ forward pass ----------------------------------

def gcn_topk2_forward(params, x, adj, *, nodes_per_graph, num_graphs, ratio=0.5):
    """x: (N, in_features) node features.
    adj: (B, n, n) batched block-diagonal adjacency, adj[b, i, j] = 1 iff graph b has edge j -> i,
    so adj[b] @ x_b is PyG GraphConv's sum-aggregation of source->target messages."""
    N, _ = x.shape
    n, B = nodes_per_graph, num_graphs
    H = params["conv1_w_root"].shape[1]
    out_features = params["lin_w"].shape[1]
    f32 = jnp.float32

    # Host-side constant prep (hoisted out of the kernels).
    pw1 = params["pool1_w"]
    pw1n = (pw1 / jnp.sqrt(jnp.sum(pw1 * pw1))).reshape(1, H)       # L2-normalized, row layout
    pw2 = params["pool2_w"]
    pw2n = (pw2 / jnp.sqrt(jnp.sum(pw2 * pw2))).reshape(1, H)
    w_max, w_mean = params["lin_w"][:H], params["lin_w"][H:]        # split for the fused readout

    # ---- layer 1: conv1 -> GELU -> bn1 -> pool1 score (one fused kernel) ----
    h, score1 = _vmem_call(
        partial(layer1_kernel, num_graphs=B, block_nodes=n),
        (jax.ShapeDtypeStruct((N, H), f32), jax.ShapeDtypeStruct((1, N), f32)),
        adj, x, params["conv1_w_root"], params["conv1_w_rel"], params["conv1_b_rel"],
        params["bn1_gamma"], params["bn1_beta"], pw1n)

    # ---- pool1: per-graph top-k selection + gathers (data-dependent, plain JAX) ----
    k1 = math.ceil(ratio * n)
    top_s1, top_i1 = jax.lax.top_k(score1.reshape(B, n), k1)        # (B, k1)
    h1 = (jnp.take_along_axis(h.reshape(B, n, H), top_i1[:, :, None], axis=1)
          * top_s1[:, :, None])                                     # (B, k1, H) = x[perm]*score
    adj1 = jnp.take_along_axis(
        jnp.take_along_axis(adj, top_i1[:, :, None], axis=1),
        top_i1[:, None, :], axis=2)                                 # (B, k1, k1) filter_adj
    N1 = B * k1

    # ---- layer 2: bn2 -> GELU -> conv2 -> pool2 score (one fused kernel) ----
    h2, score2 = _vmem_call(
        partial(layer2_kernel, num_graphs=B, block_nodes=k1),
        (jax.ShapeDtypeStruct((N1, H), f32), jax.ShapeDtypeStruct((1, N1), f32)),
        adj1, h1.reshape(N1, H), params["bn2_gamma"], params["bn2_beta"],
        params["conv2_w_root"], params["conv2_w_rel"], params["conv2_b_rel"], pw2n)

    # ---- pool2 ----
    k2 = math.ceil(ratio * k1)
    top_s2, top_i2 = jax.lax.top_k(score2.reshape(B, k1), k2)
    h2p = (jnp.take_along_axis(h2.reshape(B, k1, H), top_i2[:, :, None], axis=1)
           * top_s2[:, :, None])                                    # (B, k2, H)

    # ---- x = linear(x1 + x2) with the two [gmp|gap] readouts fused in ----
    out = _vmem_call(readout_linear_kernel, jax.ShapeDtypeStruct((B, out_features), f32),
                     h1, h2p, w_max, w_mean, params["lin_b"])
    return out


# ------------------------------ params / inputs -------------------------------

def init_params(key, in_features, hidden, out_features):
    ks = jax.random.split(key, 14)

    def dense(k, fan_in, fan_out):
        # stored transposed (fan_in, fan_out) so kernels compute x @ W
        return jax.random.normal(k, (fan_in, fan_out), jnp.float32) / math.sqrt(fan_in)

    return {
        # GraphConv(in, hidden): lin_rel (bias) on aggregated neighbors, lin_root (no bias)
        "conv1_w_rel": dense(ks[0], in_features, hidden),
        "conv1_b_rel": 0.1 * jax.random.normal(ks[1], (1, hidden), jnp.float32),
        "conv1_w_root": dense(ks[2], in_features, hidden),
        # BatchNorm(hidden)
        "bn1_gamma": 1.0 + 0.1 * jax.random.normal(ks[3], (1, hidden), jnp.float32),
        "bn1_beta": 0.1 * jax.random.normal(ks[4], (1, hidden), jnp.float32),
        # TopKPooling(hidden) projection vector, stored as (hidden, 1)
        "pool1_w": jax.random.normal(ks[5], (hidden, 1), jnp.float32) / math.sqrt(hidden),
        # GraphConv(hidden, hidden)
        "conv2_w_rel": dense(ks[6], hidden, hidden),
        "conv2_b_rel": 0.1 * jax.random.normal(ks[7], (1, hidden), jnp.float32),
        "conv2_w_root": dense(ks[8], hidden, hidden),
        "pool2_w": jax.random.normal(ks[9], (hidden, 1), jnp.float32) / math.sqrt(hidden),
        # BatchNorm(hidden)
        "bn2_gamma": 1.0 + 0.1 * jax.random.normal(ks[10], (1, hidden), jnp.float32),
        "bn2_beta": 0.1 * jax.random.normal(ks[11], (1, hidden), jnp.float32),
        # Linear(2*hidden, out)
        "lin_w": dense(ks[12], 2 * hidden, out_features),
        "lin_b": 0.1 * jax.random.normal(ks[13], (1, out_features), jnp.float32),
    }


def build_batched_ring_adjacency(num_graphs, nodes_per_graph):
    """Undirected ring inside each graph; adj[b, target, source] = 1 (no self loops)."""
    n = nodes_per_graph
    i = jnp.arange(n)
    j = (i + 1) % n
    A = jnp.zeros((n, n), jnp.float32)
    A = A.at[j, i].set(1.0)   # edge i -> j
    A = A.at[i, j].set(1.0)   # edge j -> i
    return jnp.tile(A[None, :, :], (num_graphs, 1, 1))


if __name__ == "__main__":
    B, n = 2, 8                    # 2 graphs, 8 nodes each -> 16 nodes total
    in_features, hidden, out_features = 4, 32, 32
    N = B * n

    key = jax.random.PRNGKey(0)
    k_x, k_p = jax.random.split(key)
    x = jax.random.normal(k_x, (N, in_features), jnp.float32)
    adj = build_batched_ring_adjacency(B, n)                 # (B, n, n) block-diagonal layout
    params = init_params(k_p, in_features, hidden, out_features)

    out = gcn_topk2_forward(params, x, adj, nodes_per_graph=n, num_graphs=B, ratio=0.5)
    out = jax.block_until_ready(out)
    assert out.shape == (B, out_features) and out.dtype == jnp.float32
    print("KERNEL_OK")
</pallas_src>

<mosaic_0001>
module attributes {stable_mosaic.version = 11 : i64} {
  func.func @layer1_kernel(%arg0: memref<2x8x8xf32, #tpu.memory_space<vmem>>, %arg1: memref<16x4xf32, #tpu.memory_space<vmem>>, %arg2: memref<4x32xf32, #tpu.memory_space<vmem>>, %arg3: memref<4x32xf32, #tpu.memory_space<vmem>>, %arg4: memref<1x32xf32, #tpu.memory_space<vmem>>, %arg5: memref<1x32xf32, #tpu.memory_space<vmem>>, %arg6: memref<1x32xf32, #tpu.memory_space<vmem>>, %arg7: memref<1x32xf32, #tpu.memory_space<vmem>>, %arg8: memref<16x32xf32, #tpu.memory_space<vmem>>, %arg9: memref<1x16xf32, #tpu.memory_space<vmem>>) attributes {dimension_semantics = [], scalar_prefetch = 0 : i64, scratch_operands = 0 : i64, tpu.core_type = #tpu.core_type<tc>} {
    %c0 = arith.constant 0 : index
    %c0_0 = arith.constant 0 : index
    %0 = vector.load %arg1[%c0, %c0_0] : memref<16x4xf32, #tpu.memory_space<vmem>>, vector<16x4xf32>
    %c0_1 = arith.constant 0 : index
    %c0_2 = arith.constant 0 : index
    %1 = vector.load %arg3[%c0_1, %c0_2] : memref<4x32xf32, #tpu.memory_space<vmem>>, vector<4x32xf32>
    %2 = vector.extract_strided_slice %0 {offsets = [0, 0], sizes = [8, 4], strides = [1, 1]} : vector<16x4xf32> to vector<8x4xf32>
    %c0_3 = arith.constant 0 : index
    %c0_4 = arith.constant 0 : index
    %c0_5 = arith.constant 0 : index
    %3 = vector.load %arg0[%c0_3, %c0_4, %c0_5] : memref<2x8x8xf32, #tpu.memory_space<vmem>>, vector<1x8x8xf32>
    %4 = vector.shape_cast %3 : vector<1x8x8xf32> to vector<8x8xf32>
    %cst = arith.constant dense<0.000000e+00> : vector<8x4xf32>
    %5 = tpu.matmul %4, %2, %cst {dimension_numbers = #tpu.dot_dimension_numbers<[1], [0], [0], [1], [0, 0, 1, 1], [], []>} : vector<8x8xf32>, vector<8x4xf32>, vector<8x4xf32> -> vector<8x4xf32>
    %cst_6 = arith.constant dense<0.000000e+00> : vector<8x32xf32>
    %6 = tpu.matmul %5, %1, %cst_6 {dimension_numbers = #tpu.dot_dimension_numbers<[1], [0], [0], [1], [0, 0, 1, 1], [], []>} : vector<8x4xf32>, vector<4x32xf32>, vector<8x32xf32> -> vector<8x32xf32>
    %c0_7 = arith.constant 0 : index
    %c0_8 = arith.constant 0 : index
    %7 = vector.load %arg8[%c0_7, %c0_8] : memref<16x32xf32, #tpu.memory_space<vmem>>, vector<8x32xf32>
    tpu.vector_store %arg8[%c0_7, %c0_8], %6 {strides = array<i32>} : memref<16x32xf32, #tpu.memory_space<vmem>>, vector<8x32xf32>,
    %8 = vector.extract_strided_slice %0 {offsets = [8, 0], sizes = [8, 4], strides = [1, 1]} : vector<16x4xf32> to vector<8x4xf32>
    %c1 = arith.constant 1 : index
    %c0_9 = arith.constant 0 : index
    %c0_10 = arith.constant 0 : index
    %9 = vector.load %arg0[%c1, %c0_9, %c0_10] : memref<2x8x8xf32, #tpu.memory_space<vmem>>, vector<1x8x8xf32>
    %10 = vector.shape_cast %9 : vector<1x8x8xf32> to vector<8x8xf32>
    %cst_11 = arith.constant dense<0.000000e+00> : vector<8x4xf32>
    %11 = tpu.matmul %10, %8, %cst_11 {dimension_numbers = #tpu.dot_dimension_numbers<[1], [0], [0], [1], [0, 0, 1, 1], [], []>} : vector<8x8xf32>, vector<8x4xf32>, vector<8x4xf32> -> vector<8x4xf32>
    %cst_12 = arith.constant dense<0.000000e+00> : vector<8x32xf32>
    %12 = tpu.matmul %11, %1, %cst_12 {dimension_numbers = #tpu.dot_dimension_numbers<[1], [0], [0], [1], [0, 0, 1, 1], [], []>} : vector<8x4xf32>, vector<4x32xf32>, vector<8x32xf32> -> vector<8x32xf32>
    %c8 = arith.constant 8 : index
    %c0_13 = arith.constant 0 : index
    %13 = vector.load %arg8[%c8, %c0_13] : memref<16x32xf32, #tpu.memory_space<vmem>>, vector<8x32xf32>
    tpu.vector_store %arg8[%c8, %c0_13], %12 {strides = array<i32>} : memref<16x32xf32, #tpu.memory_space<vmem>>, vector<8x32xf32>,
    %c0_14 = arith.constant 0 : index
    %c0_15 = arith.constant 0 : index
    %14 = vector.load %arg8[%c0_14, %c0_15] : memref<16x32xf32, #tpu.memory_space<vmem>>, vector<16x32xf32>
    %c0_16 = arith.constant 0 : index
    %c0_17 = arith.constant 0 : index
    %15 = vector.load %arg2[%c0_16, %c0_17] : memref<4x32xf32, #tpu.memory_space<vmem>>, vector<4x32xf32>
    %cst_18 = arith.constant dense<0.000000e+00> : vector<16x32xf32>
    %16 = tpu.matmul %0, %15, %cst_18 {dimension_numbers = #tpu.dot_dimension_numbers<[1], [0], [0], [1], [0, 0, 1, 1], [], []>} : vector<16x4xf32>, vector<4x32xf32>, vector<16x32xf32> -> vector<16x32xf32>
    %17 = arith.addf %14, %16 : vector<16x32xf32>
    %c0_19 = arith.constant 0 : index
    %c0_20 = arith.constant 0 : index
    %18 = vector.load %arg4[%c0_19, %c0_20] : memref<1x32xf32, #tpu.memory_space<vmem>>, vector<1x32xf32>
    %19 = vector.broadcast %18 : vector<1x32xf32> to vector<16x32xf32>
    %20 = arith.addf %17, %19 : vector<16x32xf32>
    %cst_21 = arith.constant 5.000000e-01 : f32
    %21 = vector.broadcast %cst_21 : f32 to vector<16x32xf32>
    %22 = arith.mulf %21, %20 : vector<16x32xf32>
    %cst_22 = arith.constant 4.471500e-02 : f32
    %23 = vector.broadcast %cst_22 : f32 to vector<16x32xf32>
    %24 = arith.mulf %23, %20 : vector<16x32xf32>
    %25 = arith.mulf %24, %20 : vector<16x32xf32>
    %26 = arith.mulf %25, %20 : vector<16x32xf32>
    %27 = arith.addf %20, %26 : vector<16x32xf32>
    %cst_23 = arith.constant 0.797884583 : f32
    %28 = vector.broadcast %cst_23 : f32 to vector<16x32xf32>
    %29 = arith.mulf %28, %27 : vector<16x32xf32>
    %30 = math.tanh %29 : vector<16x32xf32>
    %cst_24 = arith.constant 1.000000e+00 : f32
    %31 = vector.broadcast %cst_24 : f32 to vector<16x32xf32>
    %32 = arith.addf %31, %30 : vector<16x32xf32>
    %33 = arith.mulf %22, %32 : vector<16x32xf32>
    %c0_25 = arith.constant 0 : index
    %c0_26 = arith.constant 0 : index
    %34 = vector.load %arg5[%c0_25, %c0_26] : memref<1x32xf32, #tpu.memory_space<vmem>>, vector<1x32xf32>
    %c0_27 = arith.constant 0 : index
    %c0_28 = arith.constant 0 : index
    %35 = vector.load %arg6[%c0_27, %c0_28] : memref<1x32xf32, #tpu.memory_space<vmem>>, vector<1x32xf32>
    %cst_29 = arith.constant dense<0.000000e+00> : vector<32xf32>
    %36 = vector.multi_reduction <add>, %33, %cst_29 [0] : vector<16x32xf32> to vector<32xf32>
    %37 = vector.shape_cast %36 : vector<32xf32> to vector<1x32xf32>
    %38 = arith.mulf %33, %33 : vector<16x32xf32>
    %cst_30 = arith.constant dense<0.000000e+00> : vector<32xf32>
    %39 = vector.multi_reduction <add>, %38, %cst_30 [0] : vector<16x32xf32> to vector<32xf32>
    %40 = vector.shape_cast %39 : vector<32xf32> to vector<1x32xf32>
    %cst_31 = arith.constant 1.600000e+01 : f32
    %41 = vector.broadcast %cst_31 : f32 to vector<1x32xf32>
    %42 = arith.divf %37, %41 : vector<1x32xf32>
    %cst_32 = arith.constant 1.600000e+01 : f32
    %43 = vector.broadcast %cst_32 : f32 to vector<1x32xf32>
    %44 = arith.divf %40, %43 : vector<1x32xf32>
    %45 = arith.mulf %42, %42 : vector<1x32xf32>
    %46 = arith.subf %44, %45 : vector<1x32xf32>
    %47 = vector.broadcast %42 : vector<1x32xf32> to vector<16x32xf32>
    %48 = arith.subf %33, %47 : vector<16x32xf32>
    %cst_33 = arith.constant 9.99999974E-6 : f32
    %49 = vector.broadcast %cst_33 : f32 to vector<1x32xf32>
    %50 = arith.addf %46, %49 : vector<1x32xf32>
    %51 = math.rsqrt %50 : vector<1x32xf32>
    %52 = vector.broadcast %51 : vector<1x32xf32> to vector<16x32xf32>
    %53 = arith.mulf %48, %52 : vector<16x32xf32>
    %54 = vector.broadcast %34 : vector<1x32xf32> to vector<16x32xf32>
    %55 = arith.mulf %53, %54 : vector<16x32xf32>
    %56 = vector.broadcast %35 : vector<1x32xf32> to vector<16x32xf32>
    %57 = arith.addf %55, %56 : vector<16x32xf32>
    %c0_34 = arith.constant 0 : index
    %c0_35 = arith.constant 0 : index
    %58 = vector.load %arg8[%c0_34, %c0_35] : memref<16x32xf32, #tpu.memory_space<vmem>>, vector<16x32xf32>
    tpu.vector_store %arg8[%c0_34, %c0_35], %57 {strides = array<i32>} : memref<16x32xf32, #tpu.memory_space<vmem>>, vector<16x32xf32>,
    %c0_36 = arith.constant 0 : index
    %c0_37 = arith.constant 0 : index
    %59 = vector.load %arg7[%c0_36, %c0_37] : memref<1x32xf32, #tpu.memory_space<vmem>>, vector<1x32xf32>
    %cst_38 = arith.constant dense<0.000000e+00> : vector<1x16xf32>
    %60 = tpu.matmul %59, %57, %cst_38 {dimension_numbers = #tpu.dot_dimension_numbers<[1], [1], [0], [0], [0, 0, 1, 0], [], []>} : vector<1x32xf32>, vector<16x32xf32>, vector<1x16xf32> -> vector<1x16xf32>
    %61 = math.tanh %60 : vector<1x16xf32>
    %c0_39 = arith.constant 0 : index
    %c0_40 = arith.constant 0 : index
    %62 = vector.load %arg9[%c0_39, %c0_40] : memref<1x16xf32, #tpu.memory_space<vmem>>, vector<1x16xf32>
    tpu.vector_store %arg9[%c0_39, %c0_40], %61 {strides = array<i32>} : memref<1x16xf32, #tpu.memory_space<vmem>>, vector<1x16xf32>,
    return
  }
}

</mosaic_0001>

<bundles_post_ra>
// kernel: tpu_custom_call.1
= control target key start
LH: loop header
LB: loop body
LE: loop exit
PB: predicated region body
PF: predicated region fallthrough
CT: control target
= control target key end

     0   :  { %15 = vsyncpa [#allocation3], 0  ;;  %vm37_vm0 = vcmask 64512   ;;  %v749_v2 = vmov 0.0   ;;  %vm750_vm1 = vmmov 0   ;;  %s876_s0 = inlined_call_operand.vmem [shape: f32[2,8,8], index: 0, kind: input, shape index: {}]   ;;  %s877_s1 = inlined_call_operand.vmem [shape: f32[16,4], index: 1, kind: input, shape index: {}]   ;;  %s878_s2 = inlined_call_operand.vmem [shape: f32[4,32], index: 2, kind: input, shape index: {}]   ;;  %s879_s3 = inlined_call_operand.vmem [shape: f32[4,32], index: 3, kind: input, shape index: {}]   ;;  %s880_s4 = inlined_call_operand.vmem [shape: f32[1,32], index: 4, kind: input, shape index: {}]   ;;  %s881_s5 = inlined_call_operand.vmem [shape: f32[1,32], index: 5, kind: input, shape index: {}]   ;;  %s882_s6 = inlined_call_operand.vmem [shape: f32[1,32], index: 6, kind: input, shape index: {}]   ;;  %s883_s7 = inlined_call_operand.vmem [shape: f32[1,32], index: 7, kind: input, shape index: {}]   ;;  %s884_s8 = inlined_call_operand.hbm [shape: f32[16,32], index: 8, kind: output, shape index: {0}]   ;;  %s885_s9 = inlined_call_operand.hbm [shape: f32[1,16], index: 9, kind: output, shape index: {1}]  }
   0x1   :  { %v33_v0 = vld [vmem:[%s877_s1] sm:$0xff]  ;;  %650 = vmatprep.subr.mxu0 %v749_v2  ;;  %652 = vmatprep.mubr.msk.f32.mxu0 %vm750_vm1, %v749_v2  ;;  %v34_v3 = vld [vmem:[%s877_s1 + $0x8] sm:$0xff] }
   0x2   :  { %v36_v1 = vld [vmem:[%s876_s0] sm:$0xff] }
   0x3   :  { %16 = vsyncpa [#allocation5], 0  ;;  %651 = vmatpush3.msra.mxu0 %v33_v0  ;;  %655 = vmatprep.subr.mxu1 %v749_v2  ;;  %v623_v4 = vld [vmem:[%s876_s0 + $0x8] sm:$0xff]  ;;  %v35_v5 = vld [vmem:[%s879_s3] sm:$0xf]  ;;  %vm115_vm2 = vcmask 1043456  }
   0x4   :  { %653 = vmatmul.mubr.msk.f32.vlgmr.msra.gmra.mrb[0].mxu0 %vm37_vm0, %v36_v1  ;;  %660 = vmatprep.subr.mxu0 %v749_v2  ;;  %vm111_vm3 = vcmask 31744   ;;  %v342_v6 = vld [vmem:[%s878_s2] sm:$0xf]  ;;  %v751_v13 = vmov 0.0|0.0   ;;  %vm189_vm4 = vcmask 261120  }
   0x5   :  { %661 = vmatpush3.msra.mxu0 %v34_v3  ;;  %662 = vmatprep.mubr.msk.f32.mxu0 %vm750_vm1, %v749_v2  ;;  %v630_v18 = vld [vmem:[%s880_s4] ss:$0 sm:$0xff]  ;;  %vm684_vm5 = vmpackc.low %vm189_vm4, %vm189_vm4 }
   0x6   :  { %657 = vmatprep.mubr.msk.f32.mxu1 %vm750_vm1, %v749_v2  ;;  %656 = vmatpush3.msk.msra.mxu1 %vm115_vm2, %v35_v5 }
   0x7   :  { %665 = vmatprep.subr.mxu1 %v749_v2  ;;  %670 = vmatprep.subr.msk.mxu0 %vm115_vm2, %v342_v6 }
   0x8   :  { %663 = vmatmul.mubr.msk.f32.vlgmr.msra.gmra.mrb[2].mxu0 %vm37_vm0, %v623_v4 }
   0x9   :  { %672 = vmatprep.mubr.msk.f32.mxu0 %vm111_vm3, %v33_v0  ;;  %671 = vmatpush3.msk.msra.mxu0 %vm115_vm2, %v342_v6 }
   0xc   :  { %673 = vmatmul.mubr.msk.f32.vlgmr.msra.gmra.mrb[4].mxu0 %vm111_vm3, %v34_v3 }
  0xd7   :  { %v107_v7 = vpop.f32.mrb[0].mxu0 }
  0xd8   :  { %v654_v8 = vpop.f32.mrb[1].mxu0  ;;  %658 = vmatmul.mubr.msk.f32.vlgmr.msra.gmra.mrb[0].mxu1 %vm111_vm3, %v107_v7  ;;  %v631_v7 = vld [vmem:[%s881_s5] ss:$0 sm:$0xff] }
  0xd9   :  { %666 = vmatpush3.msk.msra.mxu1 %vm115_vm2, %v35_v5  ;;  %667 = vmatprep.mubr.msk.f32.mxu1 %vm750_vm1, %v749_v2 }
  0xda   :  { %682 = vmatprep.subr.bf16.mxu1 %v751_v13 }
  0xdb   :  { %v262_v9 = vpop.f32.mrb[2].mxu0 }
  0xdc   :  { %v664_v10 = vpop.f32.mrb[3].mxu0  ;;  %668 = vmatmul.mubr.msk.f32.vlgmr.msra.gmra.mrb[2].mxu1 %vm111_vm3, %v262_v9 }
  0xdd   :  { %679 = vmatprep.mubr.msk.f32.mxu1 %vm750_vm1, %v749_v2  ;;  %v632_v10 = vld [vmem:[%s882_s6] ss:$0 sm:$0xff]  ;;  %s752_s6 = smov [#allocation2]  }
  0xde   :  { %s595_s23 = sshll.u32 %s752_s6, 4  ;;  %s596_s23 = int_to_ptr.vmem [resolvable:$true] %s595_s23 }
  0xdf   :  { %v674_v11 = vpop.f32.mrb[4].mxu0  ;;  %s701_s24 = scalar_lea.vmem %s596_s23, 256  ;;  %p706_p1 = scmp.lt.s32.totalorder %s596_s23, %s596_s23 }
  0xe0   :  { %v418_v12 = vpop.f32.mrb[5].mxu0  ;;  %p702_p0 = scmp.ne.s32.totalorder %s596_s23, %s701_s24  ;;  %p707_p2 = scmp.lt.s32.totalorder %s701_s24, %s701_s24 }
  0xe2   :  { %p708_p3 = por %p707_p2, %p706_p1 }
  0xe4   :  { %p709_p4 = pnand %p708_p3, %p702_p0 }
 0x1ab   :  { %v185_v14 = vpop.f32.mrb[0].mxu1 }
 0x1ac   :  { %190 = vst.msk [vmem:[#allocation2] sm:$0xff] %vm189_vm4, %v185_v14  ;;  %v659_v15 = vpop.f32.mrb[1].mxu1 }
 0x1af   :  { %v335_v16 = vpop.f32.mrb[2].mxu1 }
 0x1b0   :  { %339 = vst.msk [vmem:[#allocation2 + $0x8] sm:$0xff] %vm189_vm4, %v335_v16  ;;  %v669_v17 = vpop.f32.mrb[3].mxu1  ;;  %v507_v16 = vld [vmem:[%s883_s7] sm:$0x1] }
 0x1b3   :  { %v340_v19 = vld [vmem:[#allocation2] sm:$0xff] }
 0x1b4   :  { %v427_v20 = vadd.f32 %v418_v12, %v340_v19 }
 0x1b6   :  { %v436_v21 = vadd.f32 %v630_v18, %v427_v20 }
 0x1b7   :  { %v341_v22 = vld [vmem:[#allocation2 + $0x8] sm:$0xff] }
 0x1b8   :  { %v428_v23 = vadd.f32 %v674_v11, %v341_v22  ;;  %v440_v24 = vmul.f32 0.044715, %v436_v21  ;;  %v438_v36 = vmul.f32 0.5, %v436_v21 }
 0x1ba   :  { %v437_v25 = vadd.f32 %v630_v18, %v428_v23  ;;  %v442_v26 = vmul.f32 %v440_v24, %v436_v21 }
 0x1bc   :  { %v441_v27 = vmul.f32 0.044715, %v437_v25  ;;  %v444_v28 = vmul.f32 %v442_v26, %v436_v21  ;;  %v439_v40 = vmul.f32 0.5, %v437_v25 }
 0x1be   :  { %v443_v29 = vmul.f32 %v441_v27, %v437_v25  ;;  %v446_v30 = vadd.f32 %v444_v28, %v436_v21 }
 0x1c0   :  { %v445_v31 = vmul.f32 %v443_v29, %v437_v25  ;;  %v448_v32 = vmul.f32 0.7978846, %v446_v30 }
 0x1c2   :  { %v447_v33 = vadd.f32 %v445_v31, %v437_v25  ;;  %693 = vtanh.f32 %v448_v32 }
 0x1c4   :  { %v449_v34 = vmul.f32 0.7978846, %v447_v33 }
 0x1c6   :  { %695 = vtanh.f32 %v449_v34 }
 0x1cc   :  { %v694_v35 = vpop.eup %693 }
 0x1cd   :  { %v452_v37 = vadd.f32 1.0, %v694_v35 }
 0x1cf   :  { %v454_v38 = vmul.f32 %v452_v37, %v438_v36 }
 0x1d0   :  { %v696_v39 = vpop.eup %695 }
 0x1d1   :  { %v453_v41 = vadd.f32 1.0, %v696_v39  ;;  %v467_v43 = vmul.f32 %v454_v38, %v454_v38  ;;  %v458_v46 = vsel %vm189_vm4, %v454_v38, 0.0 }
 0x1d3   :  { %v455_v42 = vmul.f32 %v453_v41, %v439_v40  ;;  %v469_v49 = vsel %vm189_vm4, %v467_v43, 0.0 }
 0x1d5   :  { %v459_v44 = vsel %vm189_vm4, %v455_v42, 0.0  ;;  %v468_v45 = vmul.f32 %v455_v42, %v455_v42 }
 0x1d6   :  { %v460_v47 = vadd.f32 %v459_v44, %v458_v46 }
 0x1d7   :  { %v470_v48 = vsel %vm189_vm4, %v468_v45, 0.0 }
 0x1d8   :  { %v461_v50 = vrot.slane %v460_v47, 4  ;;  %v471_v51 = vadd.f32 %v470_v48, %v469_v49 }
 0x1da   :  { %v462_v52 = vadd.f32 %v461_v50, %v460_v47  ;;  %v472_v53 = vrot.slane %v471_v51, 4 }
 0x1dc   :  { %v463_v54 = vrot.slane %v462_v52, 2  ;;  %v473_v55 = vadd.f32 %v472_v53, %v471_v51 }
 0x1de   :  { %v464_v56 = vadd.f32 %v463_v54, %v462_v52  ;;  %v474_v57 = vrot.slane %v473_v55, 2 }
 0x1e0   :  { %v465_v58 = vrot.slane %v464_v56, 1  ;;  %v475_v59 = vadd.f32 %v474_v57, %v473_v55 }
 0x1e2   :  { %v466_v60 = vadd.f32 %v465_v58, %v464_v56  ;;  %v476_v61 = vrot.slane %v475_v59, 1 }
 0x1e4   :  { %v477_v62 = vadd.f32 %v476_v61, %v475_v59  ;;  %v479_v63 = vmul.f32 0.0625, %v466_v60 }
 0x1e6   :  { %v480_v0 = vmul.f32 0.0625, %v477_v62  ;;  %v481_v1 = vmul.f32 %v479_v63, %v479_v63  ;;  %v483_v2 = vsub.f32 %v454_v38, %v479_v63  ;;  %v484_v3 = vsub.f32 %v455_v42, %v479_v63 }
 0x1e8   :  { %v482_v4 = vsub.f32 %v480_v0, %v481_v1 }
 0x1ea   :  { %v485_v5 = vadd.f32 1e-05, %v482_v4 }
 0x1ec   :  { %697 = vrsqrt.f32 %v485_v5 }
 0x1f6   :  { %v698_v6 = vpop.eup %697 }
 0x1f7   :  { %v487_v8 = vmul.f32 %v698_v6, %v483_v2  ;;  %v488_v9 = vmul.f32 %v698_v6, %v484_v3 }
 0x1f9   :  { %v495_v11 = vmul.f32 %v631_v7, %v487_v8  ;;  %v496_v12 = vmul.f32 %v631_v7, %v488_v9 }
 0x1fb   :  { %v503_v13 = vadd.f32 %v632_v10, %v495_v11  ;;  %v504_v14 = vadd.f32 %v632_v10, %v496_v12 }
 0x1fd   :  { %505 = vst.msk [vmem:[#allocation2] sm:$0xff] %vm189_vm4, %v503_v13  ;;  %v683_v15 = vpack.c.bf16 %v504_v14, %v503_v13  ;;  %506 = vst.msk [vmem:[#allocation2 + $0x8] sm:$0xff] %vm189_vm4, %v504_v14 }
 0x1ff   :  { %685 = vmatpush3.bf16.xpose.msk.msra.mxu1 %vm684_vm5, %v683_v15 }
 0x206   :  { %680 = vmatmul.mubr.msk.f32.vlgmr.msra.gmra.mrb[4].mxu1 %vm189_vm4, %v507_v16 }
 0x207   :  { %712 = shalt.err (!%p709_p4)
}
 0x208   :  { %s713_s27 = scalar_lea.hbm %s884_s8, 256 }
 0x209   :  { %p714_p5 = scmp.ne.s32.totalorder %s884_s8, %s713_s27  ;;  %p717_p6 = scmp.lt.u32.totalorder %s713_s27, %s884_s8 }
 0x20b   :  { %p719_p7 = pnand %p717_p6, %p714_p5 }
 0x20d   :  { %722 = shalt.err (!%p719_p7)
}
 0x20e   :  { %s753_s10 = smov 128   ;;  %s754_s11 = smov 8   ;;  %vm588_vm6 = vcmask 122880  }
 0x20f   :  { %601 = dma.vmem_to_hbm [thread:$0]  %s596_s23, 256, %s884_s8, [#allocation3], %s753_s10, %s753_s10, %s754_s11  }
 0x210   :  { %s755_s14 = smov [#allocation4]  }
 0x211   :  { %s608_s15 = sshll.u32 %s755_s14, 4  ;;  %s609_s15 = int_to_ptr.vmem [resolvable:$true] %s608_s15 }
 0x212   :  { %s723_s16 = scalar_lea.vmem %s609_s15, 16  ;;  %s727_s17 = scalar_lea.vmem %s609_s15, 32 }
 0x213   :  { %p724_p8 = scmp.ne.s32.totalorder %s609_s15, %s723_s16  ;;  %p728_p9 = scmp.lt.s32.totalorder %s609_s15, %s609_s15 }
 0x214   :  { %p729_p10 = scmp.lt.s32.totalorder %s727_s17, %s723_s16 }
 0x216   :  { %p730_p11 = por %p729_p10, %p728_p9 }
 0x218   :  { %p731_p12 = pnand %p730_p11, %p724_p8 }
 0x2d9   :  { %v583_v17 = vpop.f32.mrb[4].mxu1 }
 0x2da   :  { %699 = vtanh.f32 %v583_v17  ;;  %v681_v18 = vpop.f32.mrb[5].mxu1 }
 0x2e4   :  { %v700_v19 = vpop.eup %699 }
 0x2e5   :  { %589 = vst.msk [vmem:[#allocation4] sm:$0x1] %vm588_vm6, %v700_v19 }
 0x2e6   :  { %734 = shalt.err (!%p731_p12)
}
 0x2e7   :  { %s735_s8 = scalar_lea.hbm %s885_s9, 16 }
 0x2e8   :  { %p736_p13 = scmp.ne.s32.totalorder %s885_s9, %s735_s8  ;;  %p739_p0 = scmp.lt.u32.totalorder %s735_s8, %s885_s9 }
 0x2ea   :  { %p741_p1 = pnand %p739_p0, %p736_p13 }
 0x2ec   :  { %744 = shalt.err (!%p741_p1)
}
 0x2ed   :  { %611 = dma.vmem_to_hbm [thread:$0]  %s609_s15, 16, %s885_s9, [#allocation5]  }
 0x2ee   :  { %745 = dma.done.wait [#allocation3], 256  }
 0x2ef   :  { %746 = vsyncadd [#allocation3], 4294967040 }
 0x2f0   :  { %747 = dma.done.wait [#allocation5], 16  }
 0x2f1   :  { %748 = vsyncadd [#allocation5], 4294967280 }
 0x2f2   :  { %618 = vsyncpa [#allocation3], 1 }
 0x2f3   :  { %619 = vsyncpa [#allocation5], 1 }

</bundles_post_ra>
